<compile_context>
chip_gen: v5e
topology: v5e:2x2
jax: 0.10.0
libtpu: 0.0.40
codegen_flags: <defaults>
</compile_context>

<pallas_src>
import functools

import jax
import jax.numpy as jnp
from jax.experimental import pallas as pl
from jax.experimental.pallas import tpu as pltpu


def _sn_conv_tap_kernel(tap_offsets, l_pad, inv_sigma_ref, w_ref, b_ref, x_ref, o_ref):
    """One grid step: dense conv for one image, accumulated over KH*KW taps.

    inv_sigma_ref: (1, 1)            SMEM scalar 1/sigma
    w_ref:         (T, Cout, Cin)    per-tap weight matrices (resident)
    b_ref:         (Cout, 1)         bias (resident)
    x_ref:         (1, Cin, XLEN)    flattened zero-padded image (resident)
    o_ref:         (1, Cout, L_pad)  flattened dense conv output (lane-dense)
    """
    # First tap initializes the accumulator (the output block itself, f32).
    o_ref[0] = jnp.dot(w_ref[0], x_ref[0, :, pl.ds(tap_offsets[0], l_pad)],
                       preferred_element_type=jnp.float32)
    # Remaining taps: statically shifted windows of the resident flat slab.
    for t in range(1, len(tap_offsets)):
        o_ref[0] = o_ref[0] + jnp.dot(
            w_ref[t], x_ref[0, :, pl.ds(tap_offsets[t], l_pad)],
            preferred_element_type=jnp.float32)
    # Spectral-norm scale + bias (bias broadcasts over the lane axis).
    o_ref[0] = o_ref[0] * inv_sigma_ref[0, 0] + b_ref[...]


def _round_up(a, m):
    return ((a + m - 1) // m) * m


def _vmem_capacity_bytes():
    try:
        return int(pltpu.get_tpu_info().vmem_capacity_bytes)
    except Exception:
        return 64 << 20  # conservative fallback: v7x per-TensorCore VMEM


@functools.partial(jax.jit, static_argnames=("stride", "padding"))
def spectral_norm_conv(x, weight, bias, u, *, stride, padding):
    """Forward of SpectralNormConv (transpose=False).

    x:      (N, Cin, H, W)        float32, NCHW
    weight: (Cout, Cin, KH, KW)   un-normalized conv weight (weight_bar)
    bias:   (Cout,)
    u:      (Cout,)               spectral-norm power-iteration vector
    returns (out (N, Cout, OH, OW), u_new (Cout,))
    """
    n, cin, h, w = x.shape
    cout, _, kh, kw = weight.shape
    eps = 1e-12

    # --- one power iteration + sigma, hoisted out of the kernel (tiny) ---
    w_mat = weight.reshape(cout, cin * kh * kw)              # (Cout, K)
    v = w_mat.T @ u
    v = v / (jnp.linalg.norm(v) + eps)
    u_new = w_mat @ v
    u_new = u_new / (jnp.linalg.norm(u_new) + eps)
    sigma = u_new @ (w_mat @ v)
    inv_sigma = (1.0 / sigma).reshape(1, 1).astype(jnp.float32)   # SMEM scalar

    # --- geometry for the fused (flattened-window) conv ---
    hp, wp = h + 2 * padding, w + 2 * padding
    oh = (hp - kh) // stride + 1
    ow = (wp - kw) // stride + 1
    oh_d = hp - kh + 1                       # dense (stride-1) output rows
    l_out = oh_d * wp                        # dense flat output length / image
    l_pad = _round_up(l_out, 128)            # lane-dense output block
    d_max = (kh - 1) * wp + (kw - 1)         # largest tap offset
    xlen = _round_up(l_pad + d_max, 128)     # padded flat image length (>= hp*wp)

    # O(x) padding only — no 9x im2col materialization, no transposes.
    xp = jnp.pad(x, ((0, 0), (0, 0), (padding, padding), (padding, padding)))
    xflat = xp.reshape(n, cin, hp * wp).astype(jnp.float32)
    xflat = jnp.pad(xflat, ((0, 0), (0, 0), (0, xlen - hp * wp)))

    # Per-tap (Cout, Cin) weight matrices, row-major over (kh, kw).
    w_taps = jnp.transpose(weight, (2, 3, 0, 1)).reshape(kh * kw, cout, cin)
    w_taps = w_taps.astype(jnp.float32)
    b2 = bias.reshape(cout, 1).astype(jnp.float32)
    tap_offsets = tuple(i * wp + j for i in range(kh) for j in range(kw))

    # --- VMEM budget (generation-aware; blocks are double-buffered) ---
    need = (2 * 4 * (cin * xlen + cout * l_pad)
            + 2 * 4 * (kh * kw * cout * cin + cout) + (1 << 20))
    budget = _vmem_capacity_bytes() * 3 // 4
    if need > budget:
        # TODO(synk): row-tiled (halo'd) variant for very large images.
        raise NotImplementedError("per-image slab exceeds the VMEM budget")
    vmem_limit = int(min(max(need, 32 << 20), budget))

    kernel = functools.partial(_sn_conv_tap_kernel, tap_offsets, l_pad)
    out_flat = pl.pallas_call(
        kernel,
        out_shape=jax.ShapeDtypeStruct((n, cout, l_pad), jnp.float32),
        grid=(n,),
        in_specs=[
            pl.BlockSpec(memory_space=pltpu.MemorySpace.SMEM),         # inv_sigma
            pl.BlockSpec((kh * kw, cout, cin), lambda b: (0, 0, 0)),   # taps (resident)
            pl.BlockSpec((cout, 1), lambda b: (0, 0)),                 # bias (resident)
            pl.BlockSpec((1, cin, xlen), lambda b: (b, 0, 0)),         # image slab
        ],
        out_specs=pl.BlockSpec((1, cout, l_pad), lambda b: (b, 0, 0)),  # lane-dense
        compiler_params=pltpu.CompilerParams(
            dimension_semantics=("parallel",),
            vmem_limit_bytes=vmem_limit),
    )(inv_sigma, w_taps, b2, xflat)

    # Dense flat output -> NCHW: free reshape + small slice (no transpose).
    dense = out_flat[:, :, :l_out].reshape(n, cout, oh_d, wp)
    out = dense[:, :, : (oh - 1) * stride + 1 : stride,
                      : (ow - 1) * stride + 1 : stride]
    return out, u_new


def _reference(x, weight, bias, u, *, stride, padding):
    """Pure-JAX reference matching SAGAN SpectralNorm + Conv2d."""
    eps = 1e-12
    cout = weight.shape[0]
    w_mat = weight.reshape(cout, -1)
    v = w_mat.T @ u
    v = v / (jnp.linalg.norm(v) + eps)
    u_new = w_mat @ v
    u_new = u_new / (jnp.linalg.norm(u_new) + eps)
    sigma = u_new @ (w_mat @ v)
    w_sn = weight / sigma
    out = jax.lax.conv_general_dilated(
        x, w_sn, window_strides=(stride, stride),
        padding=((padding, padding), (padding, padding)),
        dimension_numbers=("NCHW", "OIHW", "NCHW"))
    return out + bias[None, :, None, None], u_new


if __name__ == "__main__":
    # Module config: in_dim=4, out_dim=8, kernel_size=3, stride=1, padding=1,
    #                transpose=False, bias=True
    N, Cin, H, W = 2, 4, 16, 16
    Cout, KH, KW = 8, 3, 3
    stride, padding = 1, 1

    key = jax.random.PRNGKey(0)
    kx, kw_, kb, ku = jax.random.split(key, 4)
    x = jax.random.normal(kx, (N, Cin, H, W), dtype=jnp.float32)
    weight = jax.random.normal(kw_, (Cout, Cin, KH, KW), dtype=jnp.float32) * 0.1
    bias = jax.random.normal(kb, (Cout,), dtype=jnp.float32) * 0.1
    u0 = jax.random.normal(ku, (Cout,), dtype=jnp.float32)
    u0 = u0 / (jnp.linalg.norm(u0) + 1e-12)

    out, u_new = spectral_norm_conv(x, weight, bias, u0, stride=stride, padding=padding)
    out = jax.block_until_ready(out)
    u_new = jax.block_until_ready(u_new)

    ref_out, ref_u = _reference(x, weight, bias, u0, stride=stride, padding=padding)
    assert out.shape == (N, Cout, H, W), out.shape
    assert jnp.allclose(out, ref_out, atol=5e-4, rtol=5e-4), \
        float(jnp.max(jnp.abs(out - ref_out)))
    assert jnp.allclose(u_new, ref_u, atol=1e-5, rtol=1e-5), \
        float(jnp.max(jnp.abs(u_new - ref_u)))

    print("KERNEL_OK")
</pallas_src>

<mosaic_0001>
module attributes {stable_mosaic.version = 11 : i64} {
  func.func @_sn_conv_tap_kernel(%arg0: i32, %arg1: memref<1x1xf32, #tpu.memory_space<smem>>, %arg2: memref<9x8x4xf32, #tpu.memory_space<vmem>>, %arg3: memref<8x1xf32, #tpu.memory_space<vmem>>, %arg4: memref<1x4x512xf32, #tpu.memory_space<vmem>>, %arg5: memref<1x8x384xf32, #tpu.memory_space<vmem>>) attributes {dimension_semantics = [#tpu.dimension_semantics<parallel>], iteration_bounds = array<i64: 2>, scalar_prefetch = 0 : i64, scratch_operands = 0 : i64, tpu.core_type = #tpu.core_type<tc>, window_params = [{transform_indices = @transform_0, window_bounds = array<i64: 1, 1>}, {pipeline_mode = #tpu.pipeline_mode<synchronous>, transform_indices = @transform_1, window_bounds = array<i64: 9, 8, 4>}, {pipeline_mode = #tpu.pipeline_mode<synchronous>, transform_indices = @transform_2, window_bounds = array<i64: 8, 1>}, {transform_indices = @transform_3, window_bounds = array<i64: 1, 4, 512>}, {transform_indices = @transform_4, window_bounds = array<i64: 1, 8, 384>}]} {
    %c0 = arith.constant 0 : index
    %c0_0 = arith.constant 0 : index
    %c0_1 = arith.constant 0 : index
    %0 = vector.load %arg2[%c0, %c0_0, %c0_1] : memref<9x8x4xf32, #tpu.memory_space<vmem>>, vector<1x8x4xf32>
    %1 = vector.shape_cast %0 : vector<1x8x4xf32> to vector<8x4xf32>
    %c0_2 = arith.constant 0 : index
    %c0_3 = arith.constant 0 : index
    %c0_4 = arith.constant 0 : index
    %2 = vector.load %arg4[%c0_2, %c0_3, %c0_4] : memref<1x4x512xf32, #tpu.memory_space<vmem>>, vector<1x4x384xf32>
    %3 = vector.shape_cast %2 : vector<1x4x384xf32> to vector<4x384xf32>
    %cst = arith.constant dense<0.000000e+00> : vector<8x384xf32>
    %4 = tpu.matmul %1, %3, %cst {dimension_numbers = #tpu.dot_dimension_numbers<[1], [0], [0], [1], [0, 0, 1, 1], [], []>} : vector<8x4xf32>, vector<4x384xf32>, vector<8x384xf32> -> vector<8x384xf32>
    %c0_5 = arith.constant 0 : index
    %c0_6 = arith.constant 0 : index
    %c0_7 = arith.constant 0 : index
    %5 = vector.load %arg5[%c0_5, %c0_6, %c0_7] : memref<1x8x384xf32, #tpu.memory_space<vmem>>, vector<1x8x384xf32>
    %6 = vector.shape_cast %5 : vector<1x8x384xf32> to vector<8x384xf32>
    %7 = vector.shape_cast %4 : vector<8x384xf32> to vector<1x8x384xf32>
    tpu.vector_store %arg5[%c0_5, %c0_6, %c0_7], %7 {strides = array<i32>} : memref<1x8x384xf32, #tpu.memory_space<vmem>>, vector<1x8x384xf32>,
    %c0_8 = arith.constant 0 : index
    %c0_9 = arith.constant 0 : index
    %c0_10 = arith.constant 0 : index
    %8 = vector.load %arg5[%c0_8, %c0_9, %c0_10] : memref<1x8x384xf32, #tpu.memory_space<vmem>>, vector<1x8x384xf32>
    %9 = vector.shape_cast %8 : vector<1x8x384xf32> to vector<8x384xf32>
    %c1 = arith.constant 1 : index
    %c0_11 = arith.constant 0 : index
    %c0_12 = arith.constant 0 : index
    %10 = vector.load %arg2[%c1, %c0_11, %c0_12] : memref<9x8x4xf32, #tpu.memory_space<vmem>>, vector<1x8x4xf32>
    %11 = vector.shape_cast %10 : vector<1x8x4xf32> to vector<8x4xf32>
    %c0_13 = arith.constant 0 : index
    %c0_14 = arith.constant 0 : index
    %c1_15 = arith.constant 1 : index
    %12 = vector.load %arg4[%c0_13, %c0_14, %c1_15] : memref<1x4x512xf32, #tpu.memory_space<vmem>>, vector<1x4x384xf32>
    %13 = vector.shape_cast %12 : vector<1x4x384xf32> to vector<4x384xf32>
    %cst_16 = arith.constant dense<0.000000e+00> : vector<8x384xf32>
    %14 = tpu.matmul %11, %13, %cst_16 {dimension_numbers = #tpu.dot_dimension_numbers<[1], [0], [0], [1], [0, 0, 1, 1], [], []>} : vector<8x4xf32>, vector<4x384xf32>, vector<8x384xf32> -> vector<8x384xf32>
    %15 = arith.addf %9, %14 : vector<8x384xf32>
    %c0_17 = arith.constant 0 : index
    %c0_18 = arith.constant 0 : index
    %c0_19 = arith.constant 0 : index
    %16 = vector.load %arg5[%c0_17, %c0_18, %c0_19] : memref<1x8x384xf32, #tpu.memory_space<vmem>>, vector<1x8x384xf32>
    %17 = vector.shape_cast %16 : vector<1x8x384xf32> to vector<8x384xf32>
    %18 = vector.shape_cast %15 : vector<8x384xf32> to vector<1x8x384xf32>
    tpu.vector_store %arg5[%c0_17, %c0_18, %c0_19], %18 {strides = array<i32>} : memref<1x8x384xf32, #tpu.memory_space<vmem>>, vector<1x8x384xf32>,
    %c0_20 = arith.constant 0 : index
    %c0_21 = arith.constant 0 : index
    %c0_22 = arith.constant 0 : index
    %19 = vector.load %arg5[%c0_20, %c0_21, %c0_22] : memref<1x8x384xf32, #tpu.memory_space<vmem>>, vector<1x8x384xf32>
    %20 = vector.shape_cast %19 : vector<1x8x384xf32> to vector<8x384xf32>
    %c2 = arith.constant 2 : index
    %c0_23 = arith.constant 0 : index
    %c0_24 = arith.constant 0 : index
    %21 = vector.load %arg2[%c2, %c0_23, %c0_24] : memref<9x8x4xf32, #tpu.memory_space<vmem>>, vector<1x8x4xf32>
    %22 = vector.shape_cast %21 : vector<1x8x4xf32> to vector<8x4xf32>
    %c0_25 = arith.constant 0 : index
    %c0_26 = arith.constant 0 : index
    %c2_27 = arith.constant 2 : index
    %23 = vector.load %arg4[%c0_25, %c0_26, %c2_27] : memref<1x4x512xf32, #tpu.memory_space<vmem>>, vector<1x4x384xf32>
    %24 = vector.shape_cast %23 : vector<1x4x384xf32> to vector<4x384xf32>
    %cst_28 = arith.constant dense<0.000000e+00> : vector<8x384xf32>
    %25 = tpu.matmul %22, %24, %cst_28 {dimension_numbers = #tpu.dot_dimension_numbers<[1], [0], [0], [1], [0, 0, 1, 1], [], []>} : vector<8x4xf32>, vector<4x384xf32>, vector<8x384xf32> -> vector<8x384xf32>
    %26 = arith.addf %20, %25 : vector<8x384xf32>
    %c0_29 = arith.constant 0 : index
    %c0_30 = arith.constant 0 : index
    %c0_31 = arith.constant 0 : index
    %27 = vector.load %arg5[%c0_29, %c0_30, %c0_31] : memref<1x8x384xf32, #tpu.memory_space<vmem>>, vector<1x8x384xf32>
    %28 = vector.shape_cast %27 : vector<1x8x384xf32> to vector<8x384xf32>
    %29 = vector.shape_cast %26 : vector<8x384xf32> to vector<1x8x384xf32>
    tpu.vector_store %arg5[%c0_29, %c0_30, %c0_31], %29 {strides = array<i32>} : memref<1x8x384xf32, #tpu.memory_space<vmem>>, vector<1x8x384xf32>,
    %c0_32 = arith.constant 0 : index
    %c0_33 = arith.constant 0 : index
    %c0_34 = arith.constant 0 : index
    %30 = vector.load %arg5[%c0_32, %c0_33, %c0_34] : memref<1x8x384xf32, #tpu.memory_space<vmem>>, vector<1x8x384xf32>
    %31 = vector.shape_cast %30 : vector<1x8x384xf32> to vector<8x384xf32>
    %c3 = arith.constant 3 : index
    %c0_35 = arith.constant 0 : index
    %c0_36 = arith.constant 0 : index
    %32 = vector.load %arg2[%c3, %c0_35, %c0_36] : memref<9x8x4xf32, #tpu.memory_space<vmem>>, vector<1x8x4xf32>
    %33 = vector.shape_cast %32 : vector<1x8x4xf32> to vector<8x4xf32>
    %c0_37 = arith.constant 0 : index
    %c0_38 = arith.constant 0 : index
    %c18 = arith.constant 18 : index
    %34 = vector.load %arg4[%c0_37, %c0_38, %c18] : memref<1x4x512xf32, #tpu.memory_space<vmem>>, vector<1x4x384xf32>
    %35 = vector.shape_cast %34 : vector<1x4x384xf32> to vector<4x384xf32>
    %cst_39 = arith.constant dense<0.000000e+00> : vector<8x384xf32>
    %36 = tpu.matmul %33, %35, %cst_39 {dimension_numbers = #tpu.dot_dimension_numbers<[1], [0], [0], [1], [0, 0, 1, 1], [], []>} : vector<8x4xf32>, vector<4x384xf32>, vector<8x384xf32> -> vector<8x384xf32>
    %37 = arith.addf %31, %36 : vector<8x384xf32>
    %c0_40 = arith.constant 0 : index
    %c0_41 = arith.constant 0 : index
    %c0_42 = arith.constant 0 : index
    %38 = vector.load %arg5[%c0_40, %c0_41, %c0_42] : memref<1x8x384xf32, #tpu.memory_space<vmem>>, vector<1x8x384xf32>
    %39 = vector.shape_cast %38 : vector<1x8x384xf32> to vector<8x384xf32>
    %40 = vector.shape_cast %37 : vector<8x384xf32> to vector<1x8x384xf32>
    tpu.vector_store %arg5[%c0_40, %c0_41, %c0_42], %40 {strides = array<i32>} : memref<1x8x384xf32, #tpu.memory_space<vmem>>, vector<1x8x384xf32>,
    %c0_43 = arith.constant 0 : index
    %c0_44 = arith.constant 0 : index
    %c0_45 = arith.constant 0 : index
    %41 = vector.load %arg5[%c0_43, %c0_44, %c0_45] : memref<1x8x384xf32, #tpu.memory_space<vmem>>, vector<1x8x384xf32>
    %42 = vector.shape_cast %41 : vector<1x8x384xf32> to vector<8x384xf32>
    %c4 = arith.constant 4 : index
    %c0_46 = arith.constant 0 : index
    %c0_47 = arith.constant 0 : index
    %43 = vector.load %arg2[%c4, %c0_46, %c0_47] : memref<9x8x4xf32, #tpu.memory_space<vmem>>, vector<1x8x4xf32>
    %44 = vector.shape_cast %43 : vector<1x8x4xf32> to vector<8x4xf32>
    %c0_48 = arith.constant 0 : index
    %c0_49 = arith.constant 0 : index
    %c19 = arith.constant 19 : index
    %45 = vector.load %arg4[%c0_48, %c0_49, %c19] : memref<1x4x512xf32, #tpu.memory_space<vmem>>, vector<1x4x384xf32>
    %46 = vector.shape_cast %45 : vector<1x4x384xf32> to vector<4x384xf32>
    %cst_50 = arith.constant dense<0.000000e+00> : vector<8x384xf32>
    %47 = tpu.matmul %44, %46, %cst_50 {dimension_numbers = #tpu.dot_dimension_numbers<[1], [0], [0], [1], [0, 0, 1, 1], [], []>} : vector<8x4xf32>, vector<4x384xf32>, vector<8x384xf32> -> vector<8x384xf32>
    %48 = arith.addf %42, %47 : vector<8x384xf32>
    %c0_51 = arith.constant 0 : index
    %c0_52 = arith.constant 0 : index
    %c0_53 = arith.constant 0 : index
    %49 = vector.load %arg5[%c0_51, %c0_52, %c0_53] : memref<1x8x384xf32, #tpu.memory_space<vmem>>, vector<1x8x384xf32>
    %50 = vector.shape_cast %49 : vector<1x8x384xf32> to vector<8x384xf32>
    %51 = vector.shape_cast %48 : vector<8x384xf32> to vector<1x8x384xf32>
    tpu.vector_store %arg5[%c0_51, %c0_52, %c0_53], %51 {strides = array<i32>} : memref<1x8x384xf32, #tpu.memory_space<vmem>>, vector<1x8x384xf32>,
    %c0_54 = arith.constant 0 : index
    %c0_55 = arith.constant 0 : index
    %c0_56 = arith.constant 0 : index
    %52 = vector.load %arg5[%c0_54, %c0_55, %c0_56] : memref<1x8x384xf32, #tpu.memory_space<vmem>>, vector<1x8x384xf32>
    %53 = vector.shape_cast %52 : vector<1x8x384xf32> to vector<8x384xf32>
    %c5 = arith.constant 5 : index
    %c0_57 = arith.constant 0 : index
    %c0_58 = arith.constant 0 : index
    %54 = vector.load %arg2[%c5, %c0_57, %c0_58] : memref<9x8x4xf32, #tpu.memory_space<vmem>>, vector<1x8x4xf32>
    %55 = vector.shape_cast %54 : vector<1x8x4xf32> to vector<8x4xf32>
    %c0_59 = arith.constant 0 : index
    %c0_60 = arith.constant 0 : index
    %c20 = arith.constant 20 : index
    %56 = vector.load %arg4[%c0_59, %c0_60, %c20] : memref<1x4x512xf32, #tpu.memory_space<vmem>>, vector<1x4x384xf32>
    %57 = vector.shape_cast %56 : vector<1x4x384xf32> to vector<4x384xf32>
    %cst_61 = arith.constant dense<0.000000e+00> : vector<8x384xf32>
    %58 = tpu.matmul %55, %57, %cst_61 {dimension_numbers = #tpu.dot_dimension_numbers<[1], [0], [0], [1], [0, 0, 1, 1], [], []>} : vector<8x4xf32>, vector<4x384xf32>, vector<8x384xf32> -> vector<8x384xf32>
    %59 = arith.addf %53, %58 : vector<8x384xf32>
    %c0_62 = arith.constant 0 : index
    %c0_63 = arith.constant 0 : index
    %c0_64 = arith.constant 0 : index
    %60 = vector.load %arg5[%c0_62, %c0_63, %c0_64] : memref<1x8x384xf32, #tpu.memory_space<vmem>>, vector<1x8x384xf32>
    %61 = vector.shape_cast %60 : vector<1x8x384xf32> to vector<8x384xf32>
    %62 = vector.shape_cast %59 : vector<8x384xf32> to vector<1x8x384xf32>
    tpu.vector_store %arg5[%c0_62, %c0_63, %c0_64], %62 {strides = array<i32>} : memref<1x8x384xf32, #tpu.memory_space<vmem>>, vector<1x8x384xf32>,
    %c0_65 = arith.constant 0 : index
    %c0_66 = arith.constant 0 : index
    %c0_67 = arith.constant 0 : index
    %63 = vector.load %arg5[%c0_65, %c0_66, %c0_67] : memref<1x8x384xf32, #tpu.memory_space<vmem>>, vector<1x8x384xf32>
    %64 = vector.shape_cast %63 : vector<1x8x384xf32> to vector<8x384xf32>
    %c6 = arith.constant 6 : index
    %c0_68 = arith.constant 0 : index
    %c0_69 = arith.constant 0 : index
    %65 = vector.load %arg2[%c6, %c0_68, %c0_69] : memref<9x8x4xf32, #tpu.memory_space<vmem>>, vector<1x8x4xf32>
    %66 = vector.shape_cast %65 : vector<1x8x4xf32> to vector<8x4xf32>
    %c0_70 = arith.constant 0 : index
    %c0_71 = arith.constant 0 : index
    %c36 = arith.constant 36 : index
    %67 = vector.load %arg4[%c0_70, %c0_71, %c36] : memref<1x4x512xf32, #tpu.memory_space<vmem>>, vector<1x4x384xf32>
    %68 = vector.shape_cast %67 : vector<1x4x384xf32> to vector<4x384xf32>
    %cst_72 = arith.constant dense<0.000000e+00> : vector<8x384xf32>
    %69 = tpu.matmul %66, %68, %cst_72 {dimension_numbers = #tpu.dot_dimension_numbers<[1], [0], [0], [1], [0, 0, 1, 1], [], []>} : vector<8x4xf32>, vector<4x384xf32>, vector<8x384xf32> -> vector<8x384xf32>
    %70 = arith.addf %64, %69 : vector<8x384xf32>
    %c0_73 = arith.constant 0 : index
    %c0_74 = arith.constant 0 : index
    %c0_75 = arith.constant 0 : index
    %71 = vector.load %arg5[%c0_73, %c0_74, %c0_75] : memref<1x8x384xf32, #tpu.memory_space<vmem>>, vector<1x8x384xf32>
    %72 = vector.shape_cast %71 : vector<1x8x384xf32> to vector<8x384xf32>
    %73 = vector.shape_cast %70 : vector<8x384xf32> to vector<1x8x384xf32>
    tpu.vector_store %arg5[%c0_73, %c0_74, %c0_75], %73 {strides = array<i32>} : memref<1x8x384xf32, #tpu.memory_space<vmem>>, vector<1x8x384xf32>,
    %c0_76 = arith.constant 0 : index
    %c0_77 = arith.constant 0 : index
    %c0_78 = arith.constant 0 : index
    %74 = vector.load %arg5[%c0_76, %c0_77, %c0_78] : memref<1x8x384xf32, #tpu.memory_space<vmem>>, vector<1x8x384xf32>
    %75 = vector.shape_cast %74 : vector<1x8x384xf32> to vector<8x384xf32>
    %c7 = arith.constant 7 : index
    %c0_79 = arith.constant 0 : index
    %c0_80 = arith.constant 0 : index
    %76 = vector.load %arg2[%c7, %c0_79, %c0_80] : memref<9x8x4xf32, #tpu.memory_space<vmem>>, vector<1x8x4xf32>
    %77 = vector.shape_cast %76 : vector<1x8x4xf32> to vector<8x4xf32>
    %c0_81 = arith.constant 0 : index
    %c0_82 = arith.constant 0 : index
    %c37 = arith.constant 37 : index
    %78 = vector.load %arg4[%c0_81, %c0_82, %c37] : memref<1x4x512xf32, #tpu.memory_space<vmem>>, vector<1x4x384xf32>
    %79 = vector.shape_cast %78 : vector<1x4x384xf32> to vector<4x384xf32>
    %cst_83 = arith.constant dense<0.000000e+00> : vector<8x384xf32>
    %80 = tpu.matmul %77, %79, %cst_83 {dimension_numbers = #tpu.dot_dimension_numbers<[1], [0], [0], [1], [0, 0, 1, 1], [], []>} : vector<8x4xf32>, vector<4x384xf32>, vector<8x384xf32> -> vector<8x384xf32>
    %81 = arith.addf %75, %80 : vector<8x384xf32>
    %c0_84 = arith.constant 0 : index
    %c0_85 = arith.constant 0 : index
    %c0_86 = arith.constant 0 : index
    %82 = vector.load %arg5[%c0_84, %c0_85, %c0_86] : memref<1x8x384xf32, #tpu.memory_space<vmem>>, vector<1x8x384xf32>
    %83 = vector.shape_cast %82 : vector<1x8x384xf32> to vector<8x384xf32>
    %84 = vector.shape_cast %81 : vector<8x384xf32> to vector<1x8x384xf32>
    tpu.vector_store %arg5[%c0_84, %c0_85, %c0_86], %84 {strides = array<i32>} : memref<1x8x384xf32, #tpu.memory_space<vmem>>, vector<1x8x384xf32>,
    %c0_87 = arith.constant 0 : index
    %c0_88 = arith.constant 0 : index
    %c0_89 = arith.constant 0 : index
    %85 = vector.load %arg5[%c0_87, %c0_88, %c0_89] : memref<1x8x384xf32, #tpu.memory_space<vmem>>, vector<1x8x384xf32>
    %86 = vector.shape_cast %85 : vector<1x8x384xf32> to vector<8x384xf32>
    %c8 = arith.constant 8 : index
    %c0_90 = arith.constant 0 : index
    %c0_91 = arith.constant 0 : index
    %87 = vector.load %arg2[%c8, %c0_90, %c0_91] : memref<9x8x4xf32, #tpu.memory_space<vmem>>, vector<1x8x4xf32>
    %88 = vector.shape_cast %87 : vector<1x8x4xf32> to vector<8x4xf32>
    %c0_92 = arith.constant 0 : index
    %c0_93 = arith.constant 0 : index
    %c38 = arith.constant 38 : index
    %89 = vector.load %arg4[%c0_92, %c0_93, %c38] : memref<1x4x512xf32, #tpu.memory_space<vmem>>, vector<1x4x384xf32>
    %90 = vector.shape_cast %89 : vector<1x4x384xf32> to vector<4x384xf32>
    %cst_94 = arith.constant dense<0.000000e+00> : vector<8x384xf32>
    %91 = tpu.matmul %88, %90, %cst_94 {dimension_numbers = #tpu.dot_dimension_numbers<[1], [0], [0], [1], [0, 0, 1, 1], [], []>} : vector<8x4xf32>, vector<4x384xf32>, vector<8x384xf32> -> vector<8x384xf32>
    %92 = arith.addf %86, %91 : vector<8x384xf32>
    %c0_95 = arith.constant 0 : index
    %c0_96 = arith.constant 0 : index
    %c0_97 = arith.constant 0 : index
    %93 = vector.load %arg5[%c0_95, %c0_96, %c0_97] : memref<1x8x384xf32, #tpu.memory_space<vmem>>, vector<1x8x384xf32>
    %94 = vector.shape_cast %93 : vector<1x8x384xf32> to vector<8x384xf32>
    %95 = vector.shape_cast %92 : vector<8x384xf32> to vector<1x8x384xf32>
    tpu.vector_store %arg5[%c0_95, %c0_96, %c0_97], %95 {strides = array<i32>} : memref<1x8x384xf32, #tpu.memory_space<vmem>>, vector<1x8x384xf32>,
    %c0_98 = arith.constant 0 : index
    %c0_99 = arith.constant 0 : index
    %c0_100 = arith.constant 0 : index
    %96 = vector.load %arg5[%c0_98, %c0_99, %c0_100] : memref<1x8x384xf32, #tpu.memory_space<vmem>>, vector<1x8x384xf32>
    %97 = vector.shape_cast %96 : vector<1x8x384xf32> to vector<8x384xf32>
    %c0_101 = arith.constant 0 : index
    %c0_102 = arith.constant 0 : index
    %98 = memref.load %arg1[%c0_101, %c0_102] : memref<1x1xf32, #tpu.memory_space<smem>>
    %99 = vector.broadcast %98 : f32 to vector<8x384xf32>
    %100 = arith.mulf %97, %99 : vector<8x384xf32>
    %c0_103 = arith.constant 0 : index
    %c0_104 = arith.constant 0 : index
    %101 = vector.load %arg3[%c0_103, %c0_104] : memref<8x1xf32, #tpu.memory_space<vmem>>, vector<8x1xf32>
    %102 = vector.broadcast %101 : vector<8x1xf32> to vector<8x384xf32>
    %103 = arith.addf %100, %102 : vector<8x384xf32>
    %c0_105 = arith.constant 0 : index
    %c0_106 = arith.constant 0 : index
    %c0_107 = arith.constant 0 : index
    %104 = vector.load %arg5[%c0_105, %c0_106, %c0_107] : memref<1x8x384xf32, #tpu.memory_space<vmem>>, vector<1x8x384xf32>
    %105 = vector.shape_cast %104 : vector<1x8x384xf32> to vector<8x384xf32>
    %106 = vector.shape_cast %103 : vector<8x384xf32> to vector<1x8x384xf32>
    tpu.vector_store %arg5[%c0_105, %c0_106, %c0_107], %106 {strides = array<i32>} : memref<1x8x384xf32, #tpu.memory_space<vmem>>, vector<1x8x384xf32>,
    return
  }
  func.func @transform_0(%arg0: i32) -> (i32, i32) {
    %c0_i32 = arith.constant 0 : i32
    %c0_i32_0 = arith.constant 0 : i32
    %c0_i32_1 = arith.constant 0 : i32
    return %c0_i32, %c0_i32_0 : i32, i32
  }
  func.func @transform_1(%arg0: i32) -> (i32, i32, i32) {
    %c0_i32 = arith.constant 0 : i32
    %c0_i32_0 = arith.constant 0 : i32
    %c0_i32_1 = arith.constant 0 : i32
    %c0_i32_2 = arith.constant 0 : i32
    return %c0_i32, %c0_i32_0, %c0_i32_1 : i32, i32, i32
  }
  func.func @transform_2(%arg0: i32) -> (i32, i32) {
    %c0_i32 = arith.constant 0 : i32
    %c0_i32_0 = arith.constant 0 : i32
    %c0_i32_1 = arith.constant 0 : i32
    return %c0_i32, %c0_i32_0 : i32, i32
  }
  func.func @transform_3(%arg0: i32) -> (i32, i32, i32) {
    %c0_i32 = arith.constant 0 : i32
    %c0_i32_0 = arith.constant 0 : i32
    %c0_i32_1 = arith.constant 0 : i32
    return %arg0, %c0_i32, %c0_i32_0 : i32, i32, i32
  }
  func.func @transform_4(%arg0: i32) -> (i32, i32, i32) {
    %c0_i32 = arith.constant 0 : i32
    %c0_i32_0 = arith.constant 0 : i32
    %c0_i32_1 = arith.constant 0 : i32
    return %arg0, %c0_i32, %c0_i32_0 : i32, i32, i32
  }
}

</mosaic_0001>

<bundles_post_ra>
// kernel: spectral_norm_conv.1
= control target key start
LH: loop header
LB: loop body
LE: loop exit
PB: predicated region body
PF: predicated region fallthrough
CT: control target
= control target key end

     0   :  { %s1321_s17 = smov 0   ;;  %s1471_s0 = inlined_call_operand.<no memory space> [shape: f32[1,1], index: 0, kind: input, shape index: {}]   ;;  %s1472_s1 = inlined_call_operand.vmem [shape: f32[9,8,4], index: 1, kind: input, shape index: {}]   ;;  %s1473_s2 = inlined_call_operand.vmem [shape: f32[8,1], index: 2, kind: input, shape index: {}]   ;;  %s1474_s3 = inlined_call_operand.vmem [shape: f32[2,4,512], index: 3, kind: input, shape index: {}]   ;;  %s1475_s4 = inlined_call_operand.vmem [shape: f32[2,8,384], index: 4, kind: output, shape index: {}]  }
   0x1   :  { %9 = sst [smem:[#allocation2]] %s1471_s0 }
   0x2 LB: > { %s1183_s18 = sadd.s32 4294967295, %s1282_s17   ;;  %p1187_p0 = scmp.ge.s32.totalorder %s1282_s17, 1  ;;  %s1282_s17 = sphi %s1321_s17, %s15_s17  }
   0x3   : > { %p163_p1 = scmp.lt.s32.totalorder %s1282_s17, 3 }
   0x5   : > { %p164_p2 = pnand %p1187_p0, %p163_p1 }
   0x6   : > { %p189_p3 = scmp.lt.s32.totalorder (!%p164_p2), %s1183_s18, 1  ;;  %s1284_s22 = smov (!%p164_p2), 127  }
   0x7   : > { %167 = sbr.rel (%p164_p2) target bundleno = 365 (0x16d), region = 36  ;;  %s1285_s23 = smov (!%p164_p2), 126  }
   0x8   : > { %s1286_s24 = smov (!%p164_p2), 110   ;;  %s1287_s25 = smov (!%p164_p2), 109  }
   0x9   : > { %s1288_s26 = smov (!%p164_p2), 108   ;;  %s1289_s27 = smov (!%p164_p2), 92  }
   0xa   : > { %s1290_s28 = smov (!%p164_p2), 91   ;;  %s1291_s29 = smov (!%p164_p2), 90  }
   0xc   : > { %s1477_s18 = smov (!%p189_p3, %s1183_s18), 1  ;;  %vm214_vm0 = vcmask 1043456   ;;  %v199_v38 = vld [vmem:[%s1472_s1] sm:$0xff]  ;;  %vm210_vm1 = vcmask 31744   ;;  %vm411_vm2 = vcmask 1031168   ;;  %v1204_v41 = vld [vmem:[%s1472_s1 + $0x10] sm:$0xff] }
   0xd   : > { %s1255_s0 = sshll.u32 %s1477_s18, 4  ;;  %vm308_vm3 = vcmask 1039360   ;;  %vm514_vm4 = vcmask 900096   ;;  %v1197_v49 = vld [vmem:[%s1472_s1 + $0x8] sm:$0xff]  ;;  %v1211_v56 = vld [vmem:[%s1472_s1 + $0x18] sm:$0xff]  ;;  %vm617_vm5 = vcmask 891904  }
   0xe   : > { %s193_s21 = scalar_lea.vmem %s1474_s3, %s1255_s0  ;;  %vm720_vm6 = vcmask 883712   ;;  %vm823_vm7 = vcmask 752640   ;;  %vm926_vm8 = vcmask 744448   ;;  %vm1029_vm9 = vcmask 736256  }
   0xf   : > { %v201_v0 = vld [vmem:[%s193_s21 + $0x8] sm:$0xf]  ;;  %v1335_v1 = vld [vmem:[%s193_s21] sm:$0xff] }
  0x10   : > { %206 = vst [vmem:[#allocation1 + $0x10] ss:$2 sm:$0xff] %v201_v0  ;;  %v1338_v2 = vld [vmem:[%s193_s21 + $0x8] sm:$0xff] }
  0x11   : > { %204 = vst [vmem:[#allocation1] ss:$2 sm:$0xff] %v1335_v1 }
  0x17   : > { %v1340_v3 = vld.sshfl [vmem:[#allocation1 + $0x10] sm:$0xff pattern:$0x75316420] }
  0x18   : > { %295 = vst [vmem:[#allocation1 + $0x10] ss:$2 sm:$0xff] %v1338_v2  ;;  %v1343_v4 = vld.sshfl [vmem:[#allocation1] sm:$0xff pattern:$0x75316420]  ;;  %1195 = vmatpush.msk.msra.mxu2 %vm214_vm0, %v1340_v3 }
  0x19   : > { %v1345_v5 = vld.sshfl [vmem:[#allocation1 + $0x8] sm:$0xff pattern:$0x75316420]  ;;  %1191 = vmatpush.msk.msra.mxu0 %vm214_vm0, %v1343_v4  ;;  %1196 = vmatmul.msk.f32.vlgmr.msra.gmra.mxu2 %vm210_vm1, %v199_v38  ;;  %v1218_v3 = vld [vmem:[%s1472_s1 + $0x20] sm:$0xff] }
  0x1a   : > { %293 = vst [vmem:[#allocation1] ss:$2 sm:$0xff] %v1335_v1  ;;  %1193 = vmatpush.msk.msra.mxu1 %vm214_vm0, %v1345_v5  ;;  %1192 = vmatmul.msk.f32.vlgmr.msra.gmra.mxu0 %vm210_vm1, %v199_v38 }
  0x1b   : > { %1194 = vmatmul.msk.f32.vlgmr.msra.gmra.mxu1 %vm210_vm1, %v199_v38 }
  0x1f   : > { %v298_v6 = vld.sshfl [vmem:[#allocation1 + $0x10] sm:$0xff pattern:$0x75316420]  ;;  %v299_v7 = vld.sshfl [vmem:[#allocation1 + $0x18] sm:$0xff pattern:$0x75316420] }
  0x20   : > { %304 = vrot.lane.b32.xlu1 %v298_v6, %s1284_s22  ;;  %398 = vst [vmem:[#allocation1 + $0x10] ss:$2 sm:$0xff] %v1338_v2 }
  0x21   : > { %v296_v8 = vld.sshfl [vmem:[#allocation1] sm:$0xff pattern:$0x75316420]  ;;  %v297_v9 = vld.sshfl [vmem:[#allocation1 + $0x8] sm:$0xff pattern:$0x75316420] }
  0x22   : > { %300 = vrot.lane.b32.xlu0 %v296_v8, %s1284_s22  ;;  %396 = vst [vmem:[#allocation1] ss:$2 sm:$0xff] %v1335_v1 }
  0x27   : > { %v402_v10 = vld.sshfl [vmem:[#allocation1 + $0x18] sm:$0xff pattern:$0x75316420]  ;;  %v401_v11 = vld.sshfl [vmem:[#allocation1 + $0x10] sm:$0xff pattern:$0x75316420] }
  0x28   : > { %306 = vrot.lane.b32.xlu1 %v299_v7, %s1284_s22  ;;  %501 = vst [vmem:[#allocation1 + $0x10] ss:$2 sm:$0xff] %v1338_v2  ;;  %v1225_v7 = vld [vmem:[%s1472_s1 + $0x28] sm:$0xff] }
  0x29   : > { %v399_v12 = vld.sshfl [vmem:[#allocation1] sm:$0xff pattern:$0x75316420]  ;;  %v400_v13 = vld.sshfl [vmem:[#allocation1 + $0x8] sm:$0xff pattern:$0x75316420] }
  0x2a   : > { %302 = vrot.lane.b32.xlu0 %v297_v9, %s1284_s22  ;;  %403 = vrot.lane.b32.xlu2 %v399_v12, %s1285_s23  ;;  %499 = vst [vmem:[#allocation1] ss:$2 sm:$0xff] %v1335_v1 }
  0x2f   : > { %v505_v14 = vld.sshfl [vmem:[#allocation1 + $0x18] sm:$0xff pattern:$0x75316420]  ;;  %v504_v15 = vld.sshfl [vmem:[#allocation1 + $0x10] sm:$0xff pattern:$0x75316420] }
  0x30   : > { %409 = vrot.lane.b32.xlu1 %v402_v10, %s1285_s23  ;;  %604 = vst [vmem:[#allocation1 + $0x10] ss:$2 sm:$0xff] %v1338_v2 }
  0x31   : > { %v503_v16 = vld.sshfl [vmem:[#allocation1 + $0x8] sm:$0xff pattern:$0x75316420]  ;;  %v502_v17 = vld.sshfl [vmem:[#allocation1] sm:$0xff pattern:$0x75316420] }
  0x32   : > { %407 = vrot.lane.b32.xlu0 %v401_v11, %s1285_s23  ;;  %405 = vrot.lane.b32.xlu2 %v400_v13, %s1285_s23  ;;  %602 = vst [vmem:[#allocation1] ss:$2 sm:$0xff] %v1335_v1 }
  0x37   : > { %v608_v18 = vld.sshfl [vmem:[#allocation1 + $0x18] sm:$0xff pattern:$0x75316420]  ;;  %v607_v19 = vld.sshfl [vmem:[#allocation1 + $0x10] sm:$0xff pattern:$0x75316420] }
  0x38   : > { %512 = vrot.lane.b32.xlu1 %v505_v14, %s1286_s24  ;;  %707 = vst [vmem:[#allocation1 + $0x10] ss:$2 sm:$0xff] %v1338_v2 }
  0x39   : > { %v605_v20 = vld.sshfl [vmem:[#allocation1] sm:$0xff pattern:$0x75316420]  ;;  %v606_v21 = vld.sshfl [vmem:[#allocation1 + $0x8] sm:$0xff pattern:$0x75316420] }
  0x3a   : > { %510 = vrot.lane.b32.xlu0 %v504_v15, %s1286_s24  ;;  %508 = vrot.lane.b32.xlu2 %v503_v16, %s1286_s24  ;;  %705 = vst [vmem:[#allocation1] ss:$2 sm:$0xff] %v1335_v1 }
  0x3f   : > { %v710_v22 = vld.sshfl [vmem:[#allocation1 + $0x10] sm:$0xff pattern:$0x75316420]  ;;  %v711_v23 = vld.sshfl [vmem:[#allocation1 + $0x18] sm:$0xff pattern:$0x75316420] }
  0x40   : > { %615 = vrot.lane.b32.xlu1 %v608_v18, %s1287_s25  ;;  %810 = vst [vmem:[#allocation1 + $0x10] ss:$2 sm:$0xff] %v1338_v2 }
  0x41   : > { %v708_v24 = vld.sshfl [vmem:[#allocation1] sm:$0xff pattern:$0x75316420]  ;;  %v709_v25 = vld.sshfl [vmem:[#allocation1 + $0x8] sm:$0xff pattern:$0x75316420] }
  0x42   : > { %613 = vrot.lane.b32.xlu0 %v607_v19, %s1287_s25  ;;  %506 = vrot.lane.b32.xlu2 %v502_v17, %s1286_s24  ;;  %808 = vst [vmem:[#allocation1] ss:$2 sm:$0xff] %v1335_v1  ;;  %v1292_v17 = vmov 0  }
  0x43   : > { %1274 = vset.pattern.permute.xlu2 %v1292_v17  ;;  %1275 = vset.pattern.permute.xlu0 %v1292_v17 }
  0x47   : > { %v813_v26 = vld.sshfl [vmem:[#allocation1 + $0x10] sm:$0xff pattern:$0x75316420]  ;;  %v814_v27 = vld.sshfl [vmem:[#allocation1 + $0x18] sm:$0xff pattern:$0x75316420] }
  0x48   : > { %712 = vrot.lane.b32.xlu1 %v708_v24, %s1288_s26  ;;  %913 = vst [vmem:[#allocation1 + $0x10] ss:$2 sm:$0xff] %v1338_v2 }
  0x49   : > { %v812_v28 = vld.sshfl [vmem:[#allocation1 + $0x8] sm:$0xff pattern:$0x75316420]  ;;  %v811_v29 = vld.sshfl [vmem:[#allocation1] sm:$0xff pattern:$0x75316420] }
  0x4a   : > { %611 = vrot.lane.b32.xlu0 %v606_v21, %s1287_s25  ;;  %609 = vrot.lane.b32.xlu2 %v605_v20, %s1287_s25  ;;  %911 = vst [vmem:[#allocation1] ss:$2 sm:$0xff] %v1335_v1  ;;  %v1232_v21 = vld [vmem:[%s1472_s1 + $0x30] sm:$0xff]  ;;  %s1111_s25 = sld [smem:[#allocation2]] }
  0x4f   : > { %v916_v30 = vld.sshfl [vmem:[#allocation1 + $0x10] sm:$0xff pattern:$0x75316420]  ;;  %v917_v31 = vld.sshfl [vmem:[#allocation1 + $0x18] sm:$0xff pattern:$0x75316420] }
  0x50   : > { %718 = vrot.lane.b32.xlu1 %v711_v23, %s1288_s26  ;;  %1016 = vst [vmem:[#allocation1 + $0x10] ss:$2 sm:$0xff] %v1338_v2 }
  0x51   : > { %v915_v32 = vld.sshfl [vmem:[#allocation1 + $0x8] sm:$0xff pattern:$0x75316420]  ;;  %v914_v33 = vld.sshfl [vmem:[#allocation1] sm:$0xff pattern:$0x75316420] }
  0x52   : > { %716 = vrot.lane.b32.xlu0 %v710_v22, %s1288_s26  ;;  %714 = vrot.lane.b32.xlu2 %v709_v25, %s1288_s26  ;;  %1014 = vst [vmem:[#allocation1] ss:$2 sm:$0xff] %v1335_v1  ;;  %s1256_s26 = smul.u32 24, %s1477_s18 }
  0x57   : > { %v1019_v34 = vld.sshfl [vmem:[#allocation1 + $0x10] sm:$0xff pattern:$0x75316420]  ;;  %v1020_v37 = vld.sshfl [vmem:[#allocation1 + $0x18] sm:$0xff pattern:$0x75316420] }
  0x58   : > { %819 = vrot.lane.b32.xlu1 %v813_v26, %s1289_s27 }
  0x59   : > { %v1018_v35 = vld.sshfl [vmem:[#allocation1 + $0x8] sm:$0xff pattern:$0x75316420]  ;;  %v1017_v36 = vld.sshfl [vmem:[#allocation1] sm:$0xff pattern:$0x75316420] }
  0x5a   : > { %817 = vrot.lane.b32.xlu0 %v812_v28, %s1289_s27  ;;  %815 = vrot.lane.b32.xlu2 %v811_v29, %s1289_s27  ;;  %v1239_v28 = vld [vmem:[%s1472_s1 + $0x38] sm:$0xff] }
  0x60   : > { %922 = vrot.lane.b32.xlu1 %v916_v30, %s1290_s28 }
  0x62   : > { %920 = vrot.lane.b32.xlu0 %v915_v32, %s1290_s28  ;;  %821 = vrot.lane.b32.xlu2 %v814_v27, %s1289_s27 }
  0x68   : > { %1025 = vrot.lane.b32.xlu1 %v1019_v34, %s1291_s29  ;;  %v1246_v34 = vld [vmem:[%s1472_s1 + $0x40] sm:$0xff] }
  0x6a   : > { %918 = vrot.lane.b32.xlu0 %v914_v33, %s1290_s28  ;;  %924 = vrot.lane.b32.xlu2 %v917_v31, %s1290_s28 }
  0x70   : > { %1023 = vrot.lane.b32.xlu1 %v1018_v35, %s1291_s29 }
  0x72   : > { %1021 = vrot.lane.b32.xlu0 %v1017_v36, %s1291_s29  ;;  %1027 = vrot.lane.b32.xlu2 %v1020_v37, %s1291_s29  ;;  %v1116_v36 = vld [vmem:[%s1473_s2] sm:$0xff]  ;;  %s198_s29 = scalar_lea.vmem %s1475_s4, %s1256_s26 }
  0x7a   : > { %1119 = vperm.xlu2 %1274, %v1116_v36  }
  0x84   : > { %v404_v39 = vpop.permute.xlu2 %403 }
  0x8c   : > { %v406_v40 = vpop.permute.xlu2 %405 }
  0x8d   : > { %v412_v42 = vsel %vm411_vm2, %v404_v39, %v406_v40 }
  0x8e   : > { %1205 = vmatpush.msk.msrb.mxu2 %vm214_vm0, %v412_v42 }
  0x8f   : > { %1206 = vmatmul.msk.f32.vlgmr.msrb.gmra.mxu2 %vm210_vm1, %v1204_v41 }
  0x92   : > { %v305_v43 = vpop.permute.xlu1 %304 }
  0x94   : > { %v301_v44 = vpop.permute.xlu0 %300  ;;  %v509_v45 = vpop.permute.xlu2 %508 }
  0x98   : > { %v258_v42 = vpop.f32.mrf.mxu1 }
  0x9a   : > { %v307_v46 = vpop.permute.xlu1 %306 }
  0x9b   : > { %v311_v47 = vsel %vm308_vm3, %v305_v43, %v307_v46 }
  0x9c   : > { %v303_v48 = vpop.permute.xlu0 %302  ;;  %1202 = vmatpush.msk.msrb.mxu1 %vm214_vm0, %v311_v47  ;;  %v507_v50 = vpop.permute.xlu2 %506 }
  0x9d   : > { %v309_v51 = vsel %vm308_vm3, %v301_v44, %v303_v48  ;;  %v310_v52 = vsel %vm308_vm3, %v303_v48, %v305_v43  ;;  %v515_v53 = vsel %vm514_vm4, %v507_v50, %v509_v45  ;;  %1203 = vmatmul.msk.f32.vlgmr.msrb.gmra.mxu1 %vm210_vm1, %v1197_v49  ;;  %v278_v43 = vpop.f32.mrf.mxu2 }
  0x9e   : > { %1198 = vmatpush.msk.msra.mxu3 %vm214_vm0, %v309_v51  ;;  %1200 = vmatpush.msk.msrb.mxu0 %vm214_vm0, %v310_v52 }
  0x9f   : > { %1199 = vmatmul.msk.f32.vlgmr.msra.gmra.mxu3 %vm210_vm1, %v1197_v49  ;;  %1212 = vmatpush.msk.msra.mxu1 %vm214_vm0, %v515_v53 }
  0xa0   : > { %1201 = vmatmul.msk.f32.vlgmr.msrb.gmra.mxu0 %vm210_vm1, %v1197_v49 }
  0xa2   : > { %v410_v54 = vpop.permute.xlu1 %409 }
  0xa4   : > { %v408_v55 = vpop.permute.xlu0 %407  ;;  %v610_v59 = vpop.permute.xlu2 %609 }
  0xa5   : > { %v414_v57 = vsel %vm411_vm2, %v408_v55, %v410_v54  ;;  %v413_v58 = vsel %vm411_vm2, %v406_v40, %v408_v55  ;;  %1213 = vmatmul.msk.f32.vlgmr.msra.gmra.mxu1 %vm210_vm1, %v1211_v56 }
  0xa6   : > { %1207 = vmatpush.msk.msrb.mxu3 %vm214_vm0, %v413_v58  ;;  %1209 = vmatpush.msk.msra.mxu0 %vm214_vm0, %v414_v57 }
  0xa7   : > { %1208 = vmatmul.msk.f32.vlgmr.msrb.gmra.mxu3 %vm210_vm1, %v1204_v41 }
  0xa8   : > { %1210 = vmatmul.msk.f32.vlgmr.msra.gmra.mxu0 %vm210_vm1, %v1204_v41  ;;  %v238_v41 = vpop.f32.mrf.mxu0 }
  0xaa   : > { %v513_v60 = vpop.permute.xlu1 %512 }
  0xac   : > { %v511_v61 = vpop.permute.xlu0 %510  ;;  %v715_v0 = vpop.permute.xlu2 %714 }
  0xad   : > { %v516_v62 = vsel %vm514_vm4, %v509_v45, %v511_v61  ;;  %v517_v63 = vsel %vm514_vm4, %v511_v61, %v513_v60 }
  0xae   : > { %1214 = vmatpush.msk.msra.mxu2 %vm214_vm0, %v516_v62  ;;  %1216 = vmatpush.msk.msra.mxu3 %vm214_vm0, %v517_v63 }
  0xaf   : > { %1215 = vmatmul.msk.f32.vlgmr.msra.gmra.mxu2 %vm210_vm1, %v1211_v56  ;;  %1217 = vmatmul.msk.f32.vlgmr.msra.gmra.mxu3 %vm210_vm1, %v1211_v56 }
  0xb2   : > { %v616_v1 = vpop.permute.xlu1 %615 }
  0xb4   : > { %v614_v2 = vpop.permute.xlu0 %613  ;;  %v816_v6 = vpop.permute.xlu2 %815 }
  0xb5   : > { %v620_v4 = vsel %vm617_vm5, %v614_v2, %v616_v1 }
  0xb6   : > { %1223 = vmatpush.msk.msrb.mxu2 %vm214_vm0, %v620_v4 }
  0xb7   : > { %1224 = vmatmul.msk.f32.vlgmr.msrb.gmra.mxu2 %vm210_vm1, %v1218_v3 }
  0xba   : > { %v713_v5 = vpop.permute.xlu1 %712 }
  0xbb   : > { %v721_v8 = vsel %vm720_vm6, %v713_v5, %v715_v0 }
  0xbc   : > { %v612_v9 = vpop.permute.xlu0 %611  ;;  %1226 = vmatpush.msk.msrb.mxu3 %vm214_vm0, %v721_v8  ;;  %v822_v14 = vpop.permute.xlu2 %821 }
  0xbd   : > { %v618_v10 = vsel %vm617_vm5, %v610_v59, %v612_v9  ;;  %v619_v11 = vsel %vm617_vm5, %v612_v9, %v614_v2  ;;  %1227 = vmatmul.msk.f32.vlgmr.msrb.gmra.mxu3 %vm210_vm1, %v1225_v7 }
  0xbe   : > { %1219 = vmatpush.msk.msrb.mxu0 %vm214_vm0, %v618_v10  ;;  %1221 = vmatpush.msk.msrb.mxu1 %vm214_vm0, %v619_v11 }
  0xbf   : > { %1220 = vmatmul.msk.f32.vlgmr.msrb.gmra.mxu0 %vm210_vm1, %v1218_v3  ;;  %1222 = vmatmul.msk.f32.vlgmr.msrb.gmra.mxu1 %vm210_vm1, %v1218_v3 }
  0xc2   : > { %v719_v12 = vpop.permute.xlu1 %718 }
  0xc4   : > { %v717_v13 = vpop.permute.xlu0 %716  ;;  %v925_v24 = vpop.permute.xlu2 %924 }
  0xc5   : > { %v722_v15 = vsel %vm720_vm6, %v715_v0, %v717_v13  ;;  %v723_v16 = vsel %vm720_vm6, %v717_v13, %v719_v12 }
  0xc6   : > { %1228 = vmatpush.msk.msra.mxu0 %vm214_vm0, %v722_v15  ;;  %1230 = vmatpush.msk.msra.mxu1 %vm214_vm0, %v723_v16 }
  0xc7   : > { %1229 = vmatmul.msk.f32.vlgmr.msra.gmra.mxu0 %vm210_vm1, %v1225_v7  ;;  %1231 = vmatmul.msk.f32.vlgmr.msra.gmra.mxu1 %vm210_vm1, %v1225_v7 }
  0xca   : > { %v820_v18 = vpop.permute.xlu1 %819 }
  0xcb   : > { %v826_v19 = vsel %vm823_vm7, %v820_v18, %v822_v14 }
  0xcc   : > { %v818_v20 = vpop.permute.xlu0 %817  ;;  %1237 = vmatpush.msk.msrb.mxu0 %vm214_vm0, %v826_v19  ;;  %v1028_v30 = vpop.permute.xlu2 %1027 }
  0xcd   : > { %v824_v22 = vsel %vm823_vm7, %v816_v6, %v818_v20  ;;  %v825_v23 = vsel %vm823_vm7, %v818_v20, %v820_v18 }
  0xce   : > { %1233 = vmatpush.msk.msra.mxu2 %vm214_vm0, %v824_v22  ;;  %1235 = vmatpush.msk.msra.mxu3 %vm214_vm0, %v825_v23 }
  0xcf   : > { %1234 = vmatmul.msk.f32.vlgmr.msra.gmra.mxu2 %vm210_vm1, %v1232_v21  ;;  %1236 = vmatmul.msk.f32.vlgmr.msra.gmra.mxu3 %vm210_vm1, %v1232_v21 }
  0xd0   : > { %1238 = vmatmul.msk.f32.vlgmr.msrb.gmra.mxu0 %vm210_vm1, %v1232_v21  ;;  %v1112_v21 = vstv %s1111_s25 }
  0xd2   : > { %v923_v25 = vpop.permute.xlu1 %922 }
  0xd3   : > { %v929_v26 = vsel %vm926_vm8, %v923_v25, %v925_v24 }
  0xd4   : > { %v921_v27 = vpop.permute.xlu0 %920  ;;  %1244 = vmatpush.msk.msrb.mxu3 %vm214_vm0, %v929_v26 }
  0xd5   : > { %v928_v29 = vsel %vm926_vm8, %v921_v27, %v923_v25  ;;  %v1120_v25 = vpop.permute.xlu2 %1119 }
  0xd6   : > { %1242 = vmatpush.msk.msrb.mxu2 %vm214_vm0, %v928_v29 }
  0xd7   : > { %1243 = vmatmul.msk.f32.vlgmr.msrb.gmra.mxu2 %vm210_vm1, %v1239_v28  ;;  %1245 = vmatmul.msk.f32.vlgmr.msrb.gmra.mxu3 %vm210_vm1, %v1239_v28 }
  0xda   : > { %v1026_v31 = vpop.permute.xlu1 %1025 }
  0xdb   : > { %v1032_v32 = vsel %vm1029_vm9, %v1026_v31, %v1028_v30 }
  0xdc   : > { %v919_v33 = vpop.permute.xlu0 %918  ;;  %1251 = vmatpush.msk.msra.mxu2 %vm214_vm0, %v1032_v32 }
  0xdd   : > { %v927_v35 = vsel %vm926_vm8, %v919_v33, %v921_v27 }
  0xde   : > { %1240 = vmatpush.msk.msrb.mxu1 %vm214_vm0, %v927_v35 }
  0xdf   : > { %1241 = vmatmul.msk.f32.vlgmr.msrb.gmra.mxu1 %vm210_vm1, %v1239_v28  ;;  %1252 = vmatmul.msk.f32.vlgmr.msra.gmra.mxu2 %vm210_vm1, %v1246_v34 }
  0xe2   : > { %v1024_v37 = vpop.permute.xlu1 %1023 }
  0xe3   : > { %v1031_v38 = vsel %vm1029_vm9, %v1024_v37, %v1026_v31 }
  0xe4   : > { %1249 = vmatpush.msk.msra.mxu1 %vm214_vm0, %v1031_v38  ;;  %v1022_v39 = vpop.permute.xlu0 %1021 }
  0xe5   : > { %v1030_v40 = vsel %vm1029_vm9, %v1022_v39, %v1024_v37 }
  0xe6   : > { %1247 = vmatpush.msk.msra.mxu0 %vm214_vm0, %v1030_v40 }
  0xe7   : > { %1248 = vmatmul.msk.f32.vlgmr.msra.gmra.mxu0 %vm210_vm1, %v1246_v34  ;;  %1250 = vmatmul.msk.f32.vlgmr.msra.gmra.mxu1 %vm210_vm1, %v1246_v34 }
 0x112   : > { %v441_v47 = vpop.f32.mrf.mxu2 }
 0x11a   : > { %v378_v46 = vpop.f32.mrf.mxu1 }
 0x11b   : > { %v383_v57 = vadd.f32 %v378_v46, %v278_v43 }
 0x11d   : > { %v358_v45 = vpop.f32.mrf.mxu0 }
 0x11e   : > { %v382_v61 = vadd.f32 %v358_v45, %v258_v42 }
 0x122   : > { %v338_v44 = vpop.f32.mrf.mxu3  ;;  %v544_v50 = vpop.f32.mrf.mxu1 }
 0x123   : > { %v381_v60 = vadd.f32 %v338_v44, %v238_v41 }
 0x125   : > { %v481_v49 = vpop.f32.mrf.mxu0  ;;  %v484_v1 = vadd.f32 %v441_v47, %v381_v60 }
 0x126   : > { %v486_v62 = vadd.f32 %v481_v49, %v383_v57 }
 0x127   : > { %v587_v5 = vadd.f32 %v544_v50, %v484_v1 }
 0x12a   : > { %v461_v48 = vpop.f32.mrf.mxu3 }
 0x12b   : > { %v485_v2 = vadd.f32 %v461_v48, %v382_v61 }
 0x132   : > { %v564_v51 = vpop.f32.mrf.mxu2  ;;  %v584_v52 = vpop.f32.mrf.mxu3 }
 0x133   : > { %v589_v3 = vadd.f32 %v584_v52, %v486_v62  ;;  %v588_v6 = vadd.f32 %v564_v51, %v485_v2 }
 0x13a   : > { %v687_v55 = vpop.f32.mrf.mxu2 }
 0x13b   : > { %v692_v7 = vadd.f32 %v687_v55, %v589_v3 }
 0x13c   : > { %v647_v53 = vpop.f32.mrf.mxu0  ;;  %v667_v54 = vpop.f32.mrf.mxu1 }
 0x13d   : > { %v690_v10 = vadd.f32 %v647_v53, %v587_v5  ;;  %v691_v11 = vadd.f32 %v667_v54, %v588_v6 }
 0x140   : > { %v750_v56 = vpop.f32.mrf.mxu3 }
 0x141   : > { %v793_v14 = vadd.f32 %v750_v56, %v690_v10 }
 0x144   : > { %v770_v58 = vpop.f32.mrf.mxu0  ;;  %v790_v63 = vpop.f32.mrf.mxu1 }
 0x145   : > { %v795_v12 = vadd.f32 %v790_v63, %v692_v7  ;;  %v794_v15 = vadd.f32 %v770_v58, %v691_v11 }
 0x14d   : > { %v893_v8 = vpop.f32.mrf.mxu0 }
 0x14e   : > { %v898_v16 = vadd.f32 %v893_v8, %v795_v12 }
 0x152   : > { %v853_v59 = vpop.f32.mrf.mxu2  ;;  %v873_v0 = vpop.f32.mrf.mxu3 }
 0x153   : > { %v896_v17 = vadd.f32 %v853_v59, %v793_v14  ;;  %v897_v18 = vadd.f32 %v873_v0, %v794_v15 }
 0x15a   : > { %v976_v4 = vpop.f32.mrf.mxu2  ;;  %v996_v13 = vpop.f32.mrf.mxu3 }
 0x15b   : > { %v1001_v19 = vadd.f32 %v996_v13, %v898_v16  ;;  %v1000_v23 = vadd.f32 %v976_v4, %v897_v18 }
 0x15c   : > { %v956_v9 = vpop.f32.mrf.mxu1 }
 0x15d   : > { %v999_v22 = vadd.f32 %v956_v9, %v896_v17 }
 0x162   : > { %v1099_v20 = vpop.f32.mrf.mxu2 }
 0x163   : > { %v1104_v24 = vadd.f32 %v1099_v20, %v1001_v19 }
 0x164   : > { %v1059_v26 = vpop.f32.mrf.mxu0  ;;  %v1079_v27 = vpop.f32.mrf.mxu1 }
 0x165   : > { %v1102_v28 = vadd.f32 %v1059_v26, %v999_v22  ;;  %v1103_v29 = vadd.f32 %v1079_v27, %v1000_v23  ;;  %v1115_v30 = vmul.f32 %v1112_v21, %v1104_v24 }
 0x167   : > { %v1113_v31 = vmul.f32 %v1112_v21, %v1102_v28  ;;  %v1114_v32 = vmul.f32 %v1112_v21, %v1103_v29  ;;  %v1124_v33 = vadd.f32 %v1120_v25, %v1115_v30 }
 0x169   : > { %v1122_v34 = vadd.f32 %v1120_v25, %v1113_v31  ;;  %v1123_v35 = vadd.f32 %v1120_v25, %v1114_v32  ;;  %1127 = vst [vmem:[%s198_s29 + $0x10] sm:$0xff] %v1124_v33 }
 0x16b   : > { %1125 = vst [vmem:[%s198_s29] sm:$0xff] %v1122_v34 }
 0x16c   : > { %1126 = vst [vmem:[%s198_s29 + $0x8] sm:$0xff] %v1123_v35 }
 0x16d PF: > { %s15_s17 = sadd.s32 1, %s1282_s17  }
 0x16e   : > { %p12_p4 = scmp.ge.s32.totalorder %s15_s17, 4  }
 0x170   :  { %14 = sbr.rel (!%p12_p4) target bundleno = 2 (0x2), region = 83 }

</bundles_post_ra>
